<compile_context>
chip_gen: v6e
topology: v6e:2x2x1
jax: 0.10.0
libtpu: 0.0.40
codegen_flags: <defaults>
</compile_context>

<pallas_src>
import numpy as np
import jax
import jax.numpy as jnp
from jax.experimental import pallas as pl
from jax.experimental.pallas import tpu as pltpu

KEY_OUTPUT = 'metric_depth'

_PI_2 = np.float32(np.pi / 2)
_PI_4 = np.float32(np.pi / 4)
_TAN_3PI_8 = np.float32(2.414213562373095)
_TAN_PI_8 = np.float32(0.4142135623730951)


def extract_key(prediction, key):
    if isinstance(prediction, dict):
        return prediction[key]
    return prediction


def _atan_f32(z):
    """float32 arctan: Cephes atanf-style reduction + degree-4 polynomial."""
    a = jnp.abs(z)
    big = a > _TAN_3PI_8          # |z| > tan(3*pi/8)
    mid = a > _TAN_PI_8           # |z| > tan(pi/8)
    x = jnp.where(big, -1.0 / a, jnp.where(mid, (a - 1.0) / (a + 1.0), a))
    y0 = jnp.where(big, _PI_2, jnp.where(mid, _PI_4, np.float32(0.0)))
    zz = x * x
    p = (((np.float32(8.05374449538e-2) * zz - np.float32(1.38776856032e-1)) * zz
          + np.float32(1.99777106478e-1)) * zz - np.float32(3.33329491539e-1))
    r = y0 + (p * zz * x + x)
    return jnp.where(z < 0, -r, r)


def _sum_all_2d(x):
    # Full 2-D reduction, kept 2-D throughout (lane reduce, then sublane reduce).
    return jnp.sum(jnp.sum(x, axis=1, keepdims=True), axis=0, keepdims=True)


def _grad_l1_kernel(pred_ref, tgt_ref, mask_ref, mag_ref, ang_ref, cnt_ref):
    p = pred_ref[...].astype(jnp.float32)   # (H, W)
    t = tgt_ref[...].astype(jnp.float32)    # (H, W)
    m = mask_ref[...]                       # (H, W) float32 in {0, 1}

    def grads(x):
        c = x[1:, 1:]
        dx = c - x[1:, :-1]
        dy = c - x[:-1, 1:]
        mag = dx * dx + dy * dy
        ang = _atan_f32(dy / (dx + np.float32(1e-10)))
        return mag, ang

    mag_p, ang_p = grads(p)
    mag_t, ang_t = grads(t)
    mg = m[1:, 1:] * m[1:, :-1] * m[:-1, 1:]   # exact AND of {0,1} floats

    s_mag = _sum_all_2d(jnp.abs(mag_p - mag_t) * mg)   # (1, 1)
    s_ang = _sum_all_2d(jnp.abs(ang_p - ang_t) * mg)   # (1, 1)
    s_cnt = _sum_all_2d(mg)                            # (1, 1)

    mag_ref[...] = jnp.broadcast_to(s_mag, mag_ref.shape)
    ang_ref[...] = jnp.broadcast_to(s_ang, ang_ref.shape)
    cnt_ref[...] = jnp.broadcast_to(s_cnt, cnt_ref.shape)


def _grad_l1_loss_pallas(pred, target, mask):
    H, W = int(pred.shape[-2]), int(pred.shape[-1])
    lead = 1
    for d in pred.shape[:-2]:
        lead *= int(d)

    pred3 = pred.reshape(lead, H, W)                    # free reshape
    tgt3 = target.reshape(lead, H, W)                   # free reshape
    mask3 = jnp.broadcast_to(mask, pred.shape).reshape(lead, H, W).astype(jnp.float32)

    out_row = jax.ShapeDtypeStruct((lead, 8, 128), jnp.float32)
    img_spec = pl.BlockSpec((None, H, W), lambda i: (i, 0, 0))
    row_spec = pl.BlockSpec((None, 8, 128), lambda i: (i, 0, 0))

    out_mag, out_ang, out_cnt = pl.pallas_call(
        _grad_l1_kernel,
        out_shape=(out_row, out_row, out_row),
        grid=(lead,),
        in_specs=[img_spec, img_spec, img_spec],
        out_specs=(row_spec, row_spec, row_spec),
        compiler_params=pltpu.CompilerParams(
            dimension_semantics=("parallel",)),
    )(pred3, tgt3, mask3)

    total_mag = jnp.sum(out_mag[:, 0, 0])
    total_ang = jnp.sum(out_ang[:, 0, 0])
    total_cnt = jnp.sum(out_cnt[:, 0, 0])
    # l1_loss is a mean over the same masked index set for both terms.
    return (total_mag + total_ang) / total_cnt


def _interpolate_bilinear_align_corners(x, out_h, out_w):
    # TODO(synk): bilinear resize (align_corners=True) is done in plain JAX on
    # the host path, not as a Pallas kernel (only hit when shapes differ).
    B, C, H, W = x.shape
    if H == out_h and W == out_w:
        return x
    x = x.astype(jnp.float32)
    ys = jnp.linspace(0.0, H - 1.0, out_h) if out_h > 1 else jnp.zeros((1,), jnp.float32)
    xs = jnp.linspace(0.0, W - 1.0, out_w) if out_w > 1 else jnp.zeros((1,), jnp.float32)
    y0 = jnp.clip(jnp.floor(ys), 0, H - 1).astype(jnp.int32)
    x0 = jnp.clip(jnp.floor(xs), 0, W - 1).astype(jnp.int32)
    y1 = jnp.minimum(y0 + 1, H - 1)
    x1 = jnp.minimum(x0 + 1, W - 1)
    wy = (ys - y0.astype(jnp.float32))[:, None]
    wx = (xs - x0.astype(jnp.float32))[None, :]
    g = lambda yi, xi: x[:, :, yi, :][:, :, :, xi]
    top = g(y0, x0) * (1.0 - wx) + g(y0, x1) * wx
    bot = g(y1, x0) * (1.0 - wx) + g(y1, x1) * wx
    return top * (1.0 - wy) + bot * wy


class GradL1Loss:
    """Pallas/JAX port of the PyTorch GradL1Loss module (gradient loss)."""

    def __init__(self):
        self.name = 'GradL1'

    def __call__(self, input, target, mask=None, interpolate=True,
                 return_interpolated=False):
        input = extract_key(input, KEY_OUTPUT)
        if input.shape[-1] != target.shape[-1] and interpolate:
            input = _interpolate_bilinear_align_corners(
                input, target.shape[-2], target.shape[-1])
        intr_input = input

        if mask is None:
            mask = jnp.ones(input.shape, dtype=bool)

        loss = _grad_l1_loss_pallas(input, target, mask)
        if not return_interpolated:
            return loss
        return loss, intr_input


if __name__ == "__main__":
    key = jax.random.PRNGKey(0)
    k1, k2, k3 = jax.random.split(key, 3)

    B, C, H, W = 2, 1, 16, 16
    pred = jax.random.uniform(k1, (B, C, H, W), jnp.float32, 0.0, 2.0)
    target = jax.random.uniform(k2, (B, C, H, W), jnp.float32, 0.0, 2.0)
    mask = jax.random.uniform(k3, (B, C, H, W), jnp.float32) > 0.2   # ~80% valid

    module = GradL1Loss()
    loss = module(pred, target, mask)
    loss = jax.block_until_ready(loss)

    # Plain-JAX reference.
    def ref_grad(x):
        dx = x[..., 1:, 1:] - x[..., 1:, :-1]
        dy = x[..., 1:, 1:] - x[..., :-1, 1:]
        return dx ** 2 + dy ** 2, jnp.arctan(dy / (dx + 1e-10))

    mag_p, ang_p = ref_grad(pred)
    mag_t, ang_t = ref_grad(target)
    mg = (mask[..., 1:, 1:] & mask[..., 1:, :-1] & mask[..., :-1, 1:]).astype(jnp.float32)
    cnt = mg.sum()
    ref = (jnp.abs(mag_p - mag_t) * mg).sum() / cnt \
        + (jnp.abs(ang_p - ang_t) * mg).sum() / cnt

    assert loss.shape == ()
    assert jnp.allclose(loss, ref, rtol=1e-4, atol=1e-4), (loss, ref)
    print("KERNEL_OK")
</pallas_src>

<mosaic_0001>
module attributes {stable_mosaic.version = 11 : i64} {
  func.func @_grad_l1_kernel(%arg0: i32, %arg1: memref<1x16x16xf32, #tpu.memory_space<vmem>>, %arg2: memref<1x16x16xf32, #tpu.memory_space<vmem>>, %arg3: memref<1x16x16xf32, #tpu.memory_space<vmem>>, %arg4: memref<1x8x128xf32, #tpu.memory_space<vmem>>, %arg5: memref<1x8x128xf32, #tpu.memory_space<vmem>>, %arg6: memref<1x8x128xf32, #tpu.memory_space<vmem>>) attributes {dimension_semantics = [#tpu.dimension_semantics<parallel>], iteration_bounds = array<i64: 2>, scalar_prefetch = 0 : i64, scratch_operands = 0 : i64, tpu.core_type = #tpu.core_type<tc>, window_params = [{transform_indices = @transform_0, window_bounds = array<i64: 1, 16, 16>}, {transform_indices = @transform_1, window_bounds = array<i64: 1, 16, 16>}, {transform_indices = @transform_2, window_bounds = array<i64: 1, 16, 16>}, {transform_indices = @transform_3, window_bounds = array<i64: 1, 8, 128>}, {transform_indices = @transform_4, window_bounds = array<i64: 1, 8, 128>}, {transform_indices = @transform_5, window_bounds = array<i64: 1, 8, 128>}]} {
    %c0 = arith.constant 0 : index
    %c0_0 = arith.constant 0 : index
    %c0_1 = arith.constant 0 : index
    %0 = vector.load %arg1[%c0, %c0_0, %c0_1] : memref<1x16x16xf32, #tpu.memory_space<vmem>>, vector<1x16x16xf32>
    %1 = vector.shape_cast %0 : vector<1x16x16xf32> to vector<16x16xf32>
    %c0_2 = arith.constant 0 : index
    %c0_3 = arith.constant 0 : index
    %c0_4 = arith.constant 0 : index
    %2 = vector.load %arg2[%c0_2, %c0_3, %c0_4] : memref<1x16x16xf32, #tpu.memory_space<vmem>>, vector<1x16x16xf32>
    %3 = vector.shape_cast %2 : vector<1x16x16xf32> to vector<16x16xf32>
    %c0_5 = arith.constant 0 : index
    %c0_6 = arith.constant 0 : index
    %c0_7 = arith.constant 0 : index
    %4 = vector.load %arg3[%c0_5, %c0_6, %c0_7] : memref<1x16x16xf32, #tpu.memory_space<vmem>>, vector<1x16x16xf32>
    %5 = vector.shape_cast %4 : vector<1x16x16xf32> to vector<16x16xf32>
    %6 = vector.extract_strided_slice %1 {offsets = [1, 1], sizes = [15, 15], strides = [1, 1]} : vector<16x16xf32> to vector<15x15xf32>
    %7 = vector.extract_strided_slice %1 {offsets = [1, 0], sizes = [15, 15], strides = [1, 1]} : vector<16x16xf32> to vector<15x15xf32>
    %8 = arith.subf %6, %7 : vector<15x15xf32>
    %9 = vector.extract_strided_slice %1 {offsets = [0, 1], sizes = [15, 15], strides = [1, 1]} : vector<16x16xf32> to vector<15x15xf32>
    %10 = arith.subf %6, %9 : vector<15x15xf32>
    %11 = arith.mulf %8, %8 : vector<15x15xf32>
    %12 = arith.mulf %10, %10 : vector<15x15xf32>
    %13 = arith.addf %11, %12 : vector<15x15xf32>
    %cst = arith.constant 1.000000e-10 : f32
    %14 = vector.broadcast %cst : f32 to vector<15x15xf32>
    %15 = arith.addf %8, %14 : vector<15x15xf32>
    %16 = arith.divf %10, %15 : vector<15x15xf32>
    %17 = math.absf %16 : vector<15x15xf32>
    %cst_8 = arith.constant 2.41421366 : f32
    %18 = vector.broadcast %cst_8 : f32 to vector<15x15xf32>
    %19 = arith.cmpf ogt, %17, %18 : vector<15x15xf32>
    %cst_9 = arith.constant 0.414213568 : f32
    %20 = vector.broadcast %cst_9 : f32 to vector<15x15xf32>
    %21 = arith.cmpf ogt, %17, %20 : vector<15x15xf32>
    %cst_10 = arith.constant -1.000000e+00 : f32
    %22 = vector.broadcast %cst_10 : f32 to vector<15x15xf32>
    %23 = arith.divf %22, %17 : vector<15x15xf32>
    %cst_11 = arith.constant 1.000000e+00 : f32
    %24 = vector.broadcast %cst_11 : f32 to vector<15x15xf32>
    %25 = arith.subf %17, %24 : vector<15x15xf32>
    %cst_12 = arith.constant 1.000000e+00 : f32
    %26 = vector.broadcast %cst_12 : f32 to vector<15x15xf32>
    %27 = arith.addf %17, %26 : vector<15x15xf32>
    %28 = arith.divf %25, %27 : vector<15x15xf32>
    %29 = arith.select %21, %28, %17 : vector<15x15xi1>, vector<15x15xf32>
    %30 = arith.select %19, %23, %29 : vector<15x15xi1>, vector<15x15xf32>
    %cst_13 = arith.constant 0.785398185 : f32
    %cst_14 = arith.constant 0.000000e+00 : f32
    %31 = vector.broadcast %cst_13 : f32 to vector<15x15xf32>
    %32 = vector.broadcast %cst_14 : f32 to vector<15x15xf32>
    %33 = arith.select %21, %31, %32 : vector<15x15xi1>, vector<15x15xf32>
    %cst_15 = arith.constant 1.57079637 : f32
    %34 = vector.broadcast %cst_15 : f32 to vector<15x15xf32>
    %35 = arith.select %19, %34, %33 : vector<15x15xi1>, vector<15x15xf32>
    %36 = arith.mulf %30, %30 : vector<15x15xf32>
    %cst_16 = arith.constant 0.0805374458 : f32
    %37 = vector.broadcast %cst_16 : f32 to vector<15x15xf32>
    %38 = arith.mulf %37, %36 : vector<15x15xf32>
    %cst_17 = arith.constant 0.138776854 : f32
    %39 = vector.broadcast %cst_17 : f32 to vector<15x15xf32>
    %40 = arith.subf %38, %39 : vector<15x15xf32>
    %41 = arith.mulf %40, %36 : vector<15x15xf32>
    %cst_18 = arith.constant 0.199777111 : f32
    %42 = vector.broadcast %cst_18 : f32 to vector<15x15xf32>
    %43 = arith.addf %41, %42 : vector<15x15xf32>
    %44 = arith.mulf %43, %36 : vector<15x15xf32>
    %cst_19 = arith.constant 0.333329499 : f32
    %45 = vector.broadcast %cst_19 : f32 to vector<15x15xf32>
    %46 = arith.subf %44, %45 : vector<15x15xf32>
    %47 = arith.mulf %46, %36 : vector<15x15xf32>
    %48 = arith.mulf %47, %30 : vector<15x15xf32>
    %49 = arith.addf %48, %30 : vector<15x15xf32>
    %50 = arith.addf %35, %49 : vector<15x15xf32>
    %cst_20 = arith.constant 0.000000e+00 : f32
    %51 = vector.broadcast %cst_20 : f32 to vector<15x15xf32>
    %52 = arith.cmpf olt, %16, %51 : vector<15x15xf32>
    %cst_21 = arith.constant 0.000000e+00 : f32
    %53 = vector.broadcast %cst_21 : f32 to vector<15x15xf32>
    %54 = arith.subf %53, %50 : vector<15x15xf32>
    %55 = arith.select %52, %54, %50 : vector<15x15xi1>, vector<15x15xf32>
    %56 = vector.extract_strided_slice %3 {offsets = [1, 1], sizes = [15, 15], strides = [1, 1]} : vector<16x16xf32> to vector<15x15xf32>
    %57 = vector.extract_strided_slice %3 {offsets = [1, 0], sizes = [15, 15], strides = [1, 1]} : vector<16x16xf32> to vector<15x15xf32>
    %58 = arith.subf %56, %57 : vector<15x15xf32>
    %59 = vector.extract_strided_slice %3 {offsets = [0, 1], sizes = [15, 15], strides = [1, 1]} : vector<16x16xf32> to vector<15x15xf32>
    %60 = arith.subf %56, %59 : vector<15x15xf32>
    %61 = arith.mulf %58, %58 : vector<15x15xf32>
    %62 = arith.mulf %60, %60 : vector<15x15xf32>
    %63 = arith.addf %61, %62 : vector<15x15xf32>
    %cst_22 = arith.constant 1.000000e-10 : f32
    %64 = vector.broadcast %cst_22 : f32 to vector<15x15xf32>
    %65 = arith.addf %58, %64 : vector<15x15xf32>
    %66 = arith.divf %60, %65 : vector<15x15xf32>
    %67 = math.absf %66 : vector<15x15xf32>
    %cst_23 = arith.constant 2.41421366 : f32
    %68 = vector.broadcast %cst_23 : f32 to vector<15x15xf32>
    %69 = arith.cmpf ogt, %67, %68 : vector<15x15xf32>
    %cst_24 = arith.constant 0.414213568 : f32
    %70 = vector.broadcast %cst_24 : f32 to vector<15x15xf32>
    %71 = arith.cmpf ogt, %67, %70 : vector<15x15xf32>
    %cst_25 = arith.constant -1.000000e+00 : f32
    %72 = vector.broadcast %cst_25 : f32 to vector<15x15xf32>
    %73 = arith.divf %72, %67 : vector<15x15xf32>
    %cst_26 = arith.constant 1.000000e+00 : f32
    %74 = vector.broadcast %cst_26 : f32 to vector<15x15xf32>
    %75 = arith.subf %67, %74 : vector<15x15xf32>
    %cst_27 = arith.constant 1.000000e+00 : f32
    %76 = vector.broadcast %cst_27 : f32 to vector<15x15xf32>
    %77 = arith.addf %67, %76 : vector<15x15xf32>
    %78 = arith.divf %75, %77 : vector<15x15xf32>
    %79 = arith.select %71, %78, %67 : vector<15x15xi1>, vector<15x15xf32>
    %80 = arith.select %69, %73, %79 : vector<15x15xi1>, vector<15x15xf32>
    %cst_28 = arith.constant 0.785398185 : f32
    %cst_29 = arith.constant 0.000000e+00 : f32
    %81 = vector.broadcast %cst_28 : f32 to vector<15x15xf32>
    %82 = vector.broadcast %cst_29 : f32 to vector<15x15xf32>
    %83 = arith.select %71, %81, %82 : vector<15x15xi1>, vector<15x15xf32>
    %cst_30 = arith.constant 1.57079637 : f32
    %84 = vector.broadcast %cst_30 : f32 to vector<15x15xf32>
    %85 = arith.select %69, %84, %83 : vector<15x15xi1>, vector<15x15xf32>
    %86 = arith.mulf %80, %80 : vector<15x15xf32>
    %cst_31 = arith.constant 0.0805374458 : f32
    %87 = vector.broadcast %cst_31 : f32 to vector<15x15xf32>
    %88 = arith.mulf %87, %86 : vector<15x15xf32>
    %cst_32 = arith.constant 0.138776854 : f32
    %89 = vector.broadcast %cst_32 : f32 to vector<15x15xf32>
    %90 = arith.subf %88, %89 : vector<15x15xf32>
    %91 = arith.mulf %90, %86 : vector<15x15xf32>
    %cst_33 = arith.constant 0.199777111 : f32
    %92 = vector.broadcast %cst_33 : f32 to vector<15x15xf32>
    %93 = arith.addf %91, %92 : vector<15x15xf32>
    %94 = arith.mulf %93, %86 : vector<15x15xf32>
    %cst_34 = arith.constant 0.333329499 : f32
    %95 = vector.broadcast %cst_34 : f32 to vector<15x15xf32>
    %96 = arith.subf %94, %95 : vector<15x15xf32>
    %97 = arith.mulf %96, %86 : vector<15x15xf32>
    %98 = arith.mulf %97, %80 : vector<15x15xf32>
    %99 = arith.addf %98, %80 : vector<15x15xf32>
    %100 = arith.addf %85, %99 : vector<15x15xf32>
    %cst_35 = arith.constant 0.000000e+00 : f32
    %101 = vector.broadcast %cst_35 : f32 to vector<15x15xf32>
    %102 = arith.cmpf olt, %66, %101 : vector<15x15xf32>
    %cst_36 = arith.constant 0.000000e+00 : f32
    %103 = vector.broadcast %cst_36 : f32 to vector<15x15xf32>
    %104 = arith.subf %103, %100 : vector<15x15xf32>
    %105 = arith.select %102, %104, %100 : vector<15x15xi1>, vector<15x15xf32>
    %106 = vector.extract_strided_slice %5 {offsets = [1, 1], sizes = [15, 15], strides = [1, 1]} : vector<16x16xf32> to vector<15x15xf32>
    %107 = vector.extract_strided_slice %5 {offsets = [1, 0], sizes = [15, 15], strides = [1, 1]} : vector<16x16xf32> to vector<15x15xf32>
    %108 = arith.mulf %106, %107 : vector<15x15xf32>
    %109 = vector.extract_strided_slice %5 {offsets = [0, 1], sizes = [15, 15], strides = [1, 1]} : vector<16x16xf32> to vector<15x15xf32>
    %110 = arith.mulf %108, %109 : vector<15x15xf32>
    %111 = arith.subf %13, %63 : vector<15x15xf32>
    %112 = math.absf %111 : vector<15x15xf32>
    %113 = arith.mulf %112, %110 : vector<15x15xf32>
    %cst_37 = arith.constant dense<0.000000e+00> : vector<15xf32>
    %114 = vector.multi_reduction <add>, %113, %cst_37 [1] : vector<15x15xf32> to vector<15xf32>
    %115 = vector.shape_cast %114 : vector<15xf32> to vector<15x1xf32>
    %cst_38 = arith.constant dense<0.000000e+00> : vector<1xf32>
    %116 = vector.multi_reduction <add>, %115, %cst_38 [0] : vector<15x1xf32> to vector<1xf32>
    %117 = vector.shape_cast %116 : vector<1xf32> to vector<1x1xf32>
    %118 = arith.subf %55, %105 : vector<15x15xf32>
    %119 = math.absf %118 : vector<15x15xf32>
    %120 = arith.mulf %119, %110 : vector<15x15xf32>
    %cst_39 = arith.constant dense<0.000000e+00> : vector<15xf32>
    %121 = vector.multi_reduction <add>, %120, %cst_39 [1] : vector<15x15xf32> to vector<15xf32>
    %122 = vector.shape_cast %121 : vector<15xf32> to vector<15x1xf32>
    %cst_40 = arith.constant dense<0.000000e+00> : vector<1xf32>
    %123 = vector.multi_reduction <add>, %122, %cst_40 [0] : vector<15x1xf32> to vector<1xf32>
    %124 = vector.shape_cast %123 : vector<1xf32> to vector<1x1xf32>
    %cst_41 = arith.constant dense<0.000000e+00> : vector<15xf32>
    %125 = vector.multi_reduction <add>, %110, %cst_41 [1] : vector<15x15xf32> to vector<15xf32>
    %126 = vector.shape_cast %125 : vector<15xf32> to vector<15x1xf32>
    %cst_42 = arith.constant dense<0.000000e+00> : vector<1xf32>
    %127 = vector.multi_reduction <add>, %126, %cst_42 [0] : vector<15x1xf32> to vector<1xf32>
    %128 = vector.shape_cast %127 : vector<1xf32> to vector<1x1xf32>
    %129 = vector.shape_cast %117 : vector<1x1xf32> to vector<1x1xf32>
    %130 = vector.broadcast %129 : vector<1x1xf32> to vector<8x128xf32>
    %c0_43 = arith.constant 0 : index
    %c0_44 = arith.constant 0 : index
    %c0_45 = arith.constant 0 : index
    %131 = vector.load %arg4[%c0_43, %c0_44, %c0_45] : memref<1x8x128xf32, #tpu.memory_space<vmem>>, vector<1x8x128xf32>
    %132 = vector.shape_cast %131 : vector<1x8x128xf32> to vector<8x128xf32>
    %133 = vector.shape_cast %130 : vector<8x128xf32> to vector<1x8x128xf32>
    tpu.vector_store %arg4[%c0_43, %c0_44, %c0_45], %133 {strides = array<i32>} : memref<1x8x128xf32, #tpu.memory_space<vmem>>, vector<1x8x128xf32>,
    %134 = vector.shape_cast %124 : vector<1x1xf32> to vector<1x1xf32>
    %135 = vector.broadcast %134 : vector<1x1xf32> to vector<8x128xf32>
    %c0_46 = arith.constant 0 : index
    %c0_47 = arith.constant 0 : index
    %c0_48 = arith.constant 0 : index
    %136 = vector.load %arg5[%c0_46, %c0_47, %c0_48] : memref<1x8x128xf32, #tpu.memory_space<vmem>>, vector<1x8x128xf32>
    %137 = vector.shape_cast %136 : vector<1x8x128xf32> to vector<8x128xf32>
    %138 = vector.shape_cast %135 : vector<8x128xf32> to vector<1x8x128xf32>
    tpu.vector_store %arg5[%c0_46, %c0_47, %c0_48], %138 {strides = array<i32>} : memref<1x8x128xf32, #tpu.memory_space<vmem>>, vector<1x8x128xf32>,
    %139 = vector.shape_cast %128 : vector<1x1xf32> to vector<1x1xf32>
    %140 = vector.broadcast %139 : vector<1x1xf32> to vector<8x128xf32>
    %c0_49 = arith.constant 0 : index
    %c0_50 = arith.constant 0 : index
    %c0_51 = arith.constant 0 : index
    %141 = vector.load %arg6[%c0_49, %c0_50, %c0_51] : memref<1x8x128xf32, #tpu.memory_space<vmem>>, vector<1x8x128xf32>
    %142 = vector.shape_cast %141 : vector<1x8x128xf32> to vector<8x128xf32>
    %143 = vector.shape_cast %140 : vector<8x128xf32> to vector<1x8x128xf32>
    tpu.vector_store %arg6[%c0_49, %c0_50, %c0_51], %143 {strides = array<i32>} : memref<1x8x128xf32, #tpu.memory_space<vmem>>, vector<1x8x128xf32>,
    return
  }
  func.func @transform_0(%arg0: i32) -> (i32, i32, i32) {
    %c0_i32 = arith.constant 0 : i32
    %c0_i32_0 = arith.constant 0 : i32
    %c0_i32_1 = arith.constant 0 : i32
    return %arg0, %c0_i32, %c0_i32_0 : i32, i32, i32
  }
  func.func @transform_1(%arg0: i32) -> (i32, i32, i32) {
    %c0_i32 = arith.constant 0 : i32
    %c0_i32_0 = arith.constant 0 : i32
    %c0_i32_1 = arith.constant 0 : i32
    return %arg0, %c0_i32, %c0_i32_0 : i32, i32, i32
  }
  func.func @transform_2(%arg0: i32) -> (i32, i32, i32) {
    %c0_i32 = arith.constant 0 : i32
    %c0_i32_0 = arith.constant 0 : i32
    %c0_i32_1 = arith.constant 0 : i32
    return %arg0, %c0_i32, %c0_i32_0 : i32, i32, i32
  }
  func.func @transform_3(%arg0: i32) -> (i32, i32, i32) {
    %c0_i32 = arith.constant 0 : i32
    %c0_i32_0 = arith.constant 0 : i32
    %c0_i32_1 = arith.constant 0 : i32
    return %arg0, %c0_i32, %c0_i32_0 : i32, i32, i32
  }
  func.func @transform_4(%arg0: i32) -> (i32, i32, i32) {
    %c0_i32 = arith.constant 0 : i32
    %c0_i32_0 = arith.constant 0 : i32
    %c0_i32_1 = arith.constant 0 : i32
    return %arg0, %c0_i32, %c0_i32_0 : i32, i32, i32
  }
  func.func @transform_5(%arg0: i32) -> (i32, i32, i32) {
    %c0_i32 = arith.constant 0 : i32
    %c0_i32_0 = arith.constant 0 : i32
    %c0_i32_1 = arith.constant 0 : i32
    return %arg0, %c0_i32, %c0_i32_0 : i32, i32, i32
  }
}

</mosaic_0001>

<bundles_post_ra>
// kernel: tpu_custom_call.1
= control target key start
LH: loop header
LB: loop body
LE: loop exit
PB: predicated region body
PF: predicated region fallthrough
CT: control target
= control target key end

     0   :  { %s1653_s0 = inlined_call_operand.hbm [shape: f32[2,16,16], index: 0, kind: input, shape index: {}]   ;;  %s1654_s1 = inlined_call_operand.hbm [shape: f32[2,16,16], index: 1, kind: input, shape index: {}]   ;;  %s1655_s2 = inlined_call_operand.hbm [shape: f32[2,16,16], index: 2, kind: input, shape index: {}]   ;;  %s1656_s3 = inlined_call_operand.hbm [shape: f32[2,8,128], index: 3, kind: output, shape index: {0}]   ;;  %s1657_s4 = inlined_call_operand.hbm [shape: f32[2,8,128], index: 4, kind: output, shape index: {1}]   ;;  %s1658_s5 = inlined_call_operand.hbm [shape: f32[2,8,128], index: 5, kind: output, shape index: {2}]  }
   0x1   :  { %1668 = sst [smem:[#allocation18_spill]] %s1653_s0 }
   0x2   :  { %1669 = sst [smem:[#allocation19_spill]] %s1654_s1 }
   0x3   :  { %11 = vsyncpa [#allocation3], 0 }
   0x4   :  { %13 = vsyncpa [#allocation3 + $0x1], 0 }
   0x5   :  { %14 = vsyncpa [#allocation6], 0 }
   0x6   :  { %16 = vsyncpa [#allocation6 + $0x1], 0 }
   0x7   :  { %17 = vsyncpa [#allocation4], 0 }
   0x8   :  { %19 = vsyncpa [#allocation4 + $0x1], 0 }
   0x9   :  { %20 = vsyncpa [#allocation10], 0 }
   0xa   :  { %22 = vsyncpa [#allocation10 + $0x1], 0  ;;  %s1245_s18 = smov 0   ;;  %s1247_s19 = smov 0  }
   0xb   :  { %s1249_s20 = smov 0   ;;  %s1251_s21 = smov 0  }
   0xc LB: > { %1670 = sst [smem:[#allocation16_spill]] %s1198_s20  ;;  %s1266_s22 = sadd.s32 4294967295, %s1202_s21   ;;  %s1202_s21 = sphi %s1251_s21, %s1694_s21   ;;  %s1198_s20 = sphi %s1249_s20, %s1691_s20   ;;  %s1194_s19 = sphi %s1247_s19, %s1693_s19   ;;  %s1190_s18 = sphi %s1245_s18, %s1692_s18  }
   0xd   : > { %s1659_s23 = sadd.s32 4294967294, %s1202_s21   ;;  %s1270_s24 = sadd.s32 1, %s1202_s21  }
   0xe   : > { %s35_s25 = sadd.s32 1, %s1198_s20  ;;  %s32_s26 = ssub.s32 %s1202_s21, %s1270_s24 }
   0xf   : > { %p42_p0 = scmp.ne.s32.totalorder %s1198_s20, %s1194_s19  ;;  %p33_p1 = scmp.eq.s32.totalorder %s32_s26, 0 }
  0x10   : > { %p43_p2 = scmp.eq.s32.totalorder %s1202_s21, 0  ;;  %p48_p3 = scmp.ne.s32.totalorder %s1194_s19, %s1190_s18 }
  0x11   : > { %p49_p4 = scmp.eq.s32.totalorder %s1266_s22, 0  ;;  %p124_p7 = scmp.eq.s32.totalorder %s1266_s22, 1 }
  0x12   : > { %s1282_s27 = scalar_select %p33_p1, %s1198_s20, %s35_s25  }
  0x13   : > { %p44_p5 = por %p43_p2, %p42_p0  ;;  %p1284_p6 = por %p49_p4, %p48_p3 }
  0x14   : > { %1671 = sst [smem:[#allocation17_spill]] %s1282_s27  ;;  %p130_p8 = scmp.eq.s32.totalorder %s1659_s23, 1 }
  0x15   : > { %s1672_s28 = scalar_select %p1284_p6, 1, 0 }
  0x16   : > { %p931_p10 = scmp.lt.s32.totalorder %s1202_s21, 2  ;;  %p1293_p11 = por %p124_p7, %p42_p0 }
  0x17   : > { %p1297_p12 = por %p130_p8, %p48_p3  ;;  %s1660_s6 = sand.u32 1, %s1198_s20  }
  0x18   : > { %s1673_s29 = scalar_select %p1293_p11, 1, 0 }
  0x19   : > { %s1674_s30 = scalar_select %p1297_p12, 1, 0 }
  0x1a   : > { %s1303_s7 = sshll.u32 %s1202_s21, 8  ;;  %s1307_s8 = sshll.u32 %s1660_s6, 4 }
  0x1b   : > { %p1309_p13 = pnand %p931_p10, %p44_p5  ;;  %s223_s10 = sand.u32 1, %s1202_s21  }
  0x1c   : > { %s1676_s1 = sld [smem:[#allocation19_spill]]  ;;  %s227_s14 = scalar_lea.vmem [#allocation5], %s1307_s8 }
  0x1d   : > { %s234_s15 = sshll.u32 %s227_s14, 4  ;;  %s1324_s16 = scalar_lea.sflag [#allocation6], %s223_s10  ;;  %s1321_s15 = int_to_ptr.vmem [resolvable:$true] %s234_s15 }
  0x1e   : > { %p1330_p2 = pneg %p1309_p13 }
  0x22   : > { %s1318_s13 = scalar_lea.hbm %s1676_s1, %s1303_s7  ;;  %s999_s12 = scalar_lea.hbm %s1676_s1, 512 }
  0x23   : > { %s994_s17 = scalar_lea.hbm %s1318_s13, 256  ;;  %p1000_p5 = scmp.lt.s32.totalorder %s1318_s13, %s1676_s1 }
  0x24   : > { %p995_p1 = scmp.ne.s32.totalorder %s1318_s13, %s994_s17  ;;  %p1001_p7 = scmp.lt.s32.totalorder %s999_s12, %s994_s17 }
  0x26   : > { %p997_p3 = pnand %p1330_p2, %p995_p1  ;;  %p1002_p8 = por %p1001_p7, %p1000_p5 }
  0x28   : > { %p998_p4 = pneg %p997_p3 }
  0x2a   : > { %p1003_p10 = pnand %p1002_p8, %p998_p4 }
  0x2c   : > { %1006 = shalt.err (!%p1003_p10)
}
  0x2d   : > { %s1007_s10 = scalar_lea.vmem %s1321_s15, 256  ;;  %s1204_s6 = smov [#allocation5]  }
  0x2e   : > { %p1008_p9 = scmp.ne.s32.totalorder %s1321_s15, %s1007_s10  ;;  %s1012_s26 = sshll.u32 %s1204_s6, 4  ;;  %s1013_s26 = int_to_ptr.vmem [resolvable:$false] %s1012_s26 }
  0x2f   : > { %s1014_s11 = scalar_lea.vmem %s1013_s26, 512  ;;  %p1015_p0 = scmp.lt.s32.totalorder %s1321_s15, %s1013_s26 }
  0x30   : > { %p1010_p1 = pnand %p1008_p9, %p1330_p2  ;;  %p1016_p12 = scmp.lt.s32.totalorder %s1014_s11, %s1007_s10 }
  0x32   : > { %p1011_p3 = pneg %p1010_p1  ;;  %p1017_p11 = por %p1016_p12, %p1015_p0 }
  0x34   : > { %p1018_p6 = pnand %p1017_p11, %p1011_p3 }
  0x36   : > { %1021 = shalt.err (!%p1018_p6)
}
  0x37   : > { %s1663_s23 = smov 128   ;;  %s1665_s17 = smov 8  }
  0x38   : > { %917 = dma.hbm_to_vmem [thread:$0]  (!%p1309_p13), %s1318_s13, 256, %s1321_s15, %s1324_s16, %s1663_s23, %s1663_s23, %s1665_s17  }
  0x39   : > { %p263_p9 = scmp.lt.s32.totalorder %s1202_s21, 3  ;;  %s1678_s0 = sld [smem:[#allocation18_spill]] }
  0x3a   : > { %p1679_p6 = scmp.ge.s32.totalorder %s1202_s21, 1  ;;  %s206_s26 = scalar_lea.vmem [#allocation2], %s1307_s8 }
  0x3b   : > { %s213_s11 = sshll.u32 %s206_s26, 4  ;;  %s1681_s1 = sand.u32 1, %s1198_s20   ;;  %s1370_s11 = int_to_ptr.vmem [resolvable:$true] %s213_s11 }
  0x3c   : > { %p1365_p11 = pnand %p1679_p6, %p263_p9  ;;  %s203_s13 = scalar_lea.sflag [#allocation3], %s1681_s1 }
  0x3e   : > { %s1680_s10 = scalar_select %p1365_p11, 1, 0 }
  0x3f   : > { %s1361_s14 = scalar_lea.hbm %s1678_s0, %s1303_s7  ;;  %s1027_s23 = scalar_lea.hbm %s1678_s0, 512 }
  0x40   : > { %s1022_s15 = scalar_lea.hbm %s1361_s14, 256  ;;  %p1028_p5 = scmp.lt.s32.totalorder %s1361_s14, %s1678_s0 }
  0x41   : > { %p1023_p12 = scmp.ne.s32.totalorder %s1361_s14, %s1022_s15  ;;  %p1029_p7 = scmp.lt.s32.totalorder %s1027_s23, %s1022_s15 }
  0x43   : > { %p1025_p0 = pnand %p1023_p12, %p1330_p2  ;;  %p1030_p8 = por %p1029_p7, %p1028_p5 }
  0x45   : > { %p1026_p4 = pneg %p1025_p0 }
  0x47   : > { %p1031_p10 = pnand %p1030_p8, %p1026_p4 }
  0x49   : > { %1034 = shalt.err (!%p1031_p10)
}
  0x4a   : > { %s1035_s1 = scalar_lea.vmem %s1370_s11, 256  ;;  %s1207_s26 = smov [#allocation2]  }
  0x4b   : > { %p1036_p1 = scmp.ne.s32.totalorder %s1370_s11, %s1035_s1  ;;  %s1040_s6 = sshll.u32 %s1207_s26, 4  ;;  %s1041_s6 = int_to_ptr.vmem [resolvable:$false] %s1040_s6 }
  0x4c   : > { %s1042_s12 = scalar_lea.vmem %s1041_s6, 512  ;;  %p1043_p6 = scmp.lt.s32.totalorder %s1370_s11, %s1041_s6 }
  0x4d   : > { %p1038_p3 = pnand %p1036_p1, %p1330_p2  ;;  %p1044_p12 = scmp.lt.s32.totalorder %s1042_s12, %s1035_s1 }
  0x4f   : > { %p1039_p9 = pneg %p1038_p3  ;;  %p1045_p0 = por %p1044_p12, %p1043_p6 }
  0x51   : > { %p1046_p11 = pnand %p1045_p0, %p1039_p9 }
  0x53   : > { %1049 = shalt.err (!%p1046_p11)
}
  0x54   : > { %s1682_s27 = smov 8   ;;  %s1683_s23 = smov 128  }
  0x55   : > { %914 = dma.hbm_to_vmem [thread:$0]  (!%p1309_p13), %s1361_s14, 256, %s1370_s11, %s203_s13, %s1683_s23, %s1683_s23, %s1682_s27  }
  0x56   : > { %s1401_s26 = scalar_lea.hbm %s1655_s2, %s1303_s7  ;;  %s248_s1 = scalar_lea.vmem [#allocation7], %s1307_s8 }
  0x57   : > { %s255_s6 = sshll.u32 %s248_s1, 4  ;;  %s1050_s12 = scalar_lea.hbm %s1401_s26, 256  ;;  %s256_s6 = int_to_ptr.vmem [resolvable:$true] %s255_s6 }
  0x58   : > { %p1051_p11 = scmp.ne.s32.totalorder %s1401_s26, %s1050_s12  ;;  %s1055_s14 = scalar_lea.hbm %s1655_s2, 512 }
  0x59   : > { %p1056_p7 = scmp.lt.s32.totalorder %s1401_s26, %s1655_s2  ;;  %p1057_p8 = scmp.lt.s32.totalorder %s1055_s14, %s1050_s12 }
  0x5a   : > { %p1053_p4 = pnand %p1051_p11, %p1330_p2 }
  0x5b   : > { %p1058_p10 = por %p1057_p8, %p1056_p7 }
  0x5c   : > { %p1054_p5 = pneg %p1053_p4 }
  0x5e   : > { %p1059_p1 = pnand %p1058_p10, %p1054_p5 }
  0x60   : > { %1062 = shalt.err (!%p1059_p1)
}
  0x61   : > { %s1063_s7 = scalar_lea.vmem %s256_s6, 256  ;;  %s1208_s8 = smov [#allocation7]  }
  0x62   : > { %p1064_p3 = scmp.ne.s32.totalorder %s256_s6, %s1063_s7  ;;  %s1068_s17 = sshll.u32 %s1208_s8, 4  ;;  %s1069_s17 = int_to_ptr.vmem [resolvable:$false] %s1068_s17 }
  0x63   : > { %s1070_s15 = scalar_lea.vmem %s1069_s17, 512  ;;  %p1071_p12 = scmp.lt.s32.totalorder %s256_s6, %s1069_s17 }
  0x64   : > { %p1066_p9 = pnand %p1064_p3, %p1330_p2  ;;  %p1072_p0 = scmp.lt.s32.totalorder %s1070_s15, %s1063_s7 }
  0x66   : > { %p1067_p6 = pneg %p1066_p9  ;;  %p1073_p11 = por %p1072_p0, %p1071_p12 }
  0x68   : > { %p1074_p4 = pnand %p1073_p11, %p1067_p6 }
  0x6a   : > { %1077 = shalt.err (!%p1074_p4)
}
  0x6b   : > { %920 = dma.hbm_to_vmem [thread:$0]  (!%p1309_p13), %s1401_s26, 256, %s256_s6, %s1324_s16, %s1683_s23, %s1683_s23, %s1682_s27  }
  0x6c   : > { %p1684_p2 = scmp.ne.s32.totalorder %s1680_s10, 0 }
  0x6d   : > { %s1427_s0 = sand.u32 (!%p1684_p2), 1, %s1194_s19   ;;  %p1685_p5 = scmp.ne.s32.totalorder (!%p1684_p2), %s1672_s28, 0 }
  0x6e   : > { %267 = sbr.rel (%p1684_p2) target bundleno = 620 (0x26c), region = 32  ;;  %s870_s20 = sshll.u32 (!%p1684_p2), %s1427_s0, 4 }
  0x6f   : > { %s270_s25 = scalar_lea.sflag (!%p1684_p2), [#allocation3], %s1427_s0  ;;  %s273_s1 = scalar_lea.vmem (!%p1684_p2), [#allocation2], %s870_s20 }
  0x73   : > { %1173 = dma.done.wait (%p1685_p5), %s270_s25, 256  }
  0x74   : > { %1175 = vsyncadd (%p1685_p5), %s270_s25, 4294967040  ;;  %s278_s9 = sand.u32 1, %s1266_s22   ;;  %s282_s10 = scalar_lea.vmem [#allocation5], %s870_s20 }
  0x75   : > { %s279_s16 = scalar_lea.sflag [#allocation6], %s278_s9 }
  0x76   : > { %1177 = dma.done.wait (%p1685_p5), %s279_s16, 512  }
  0x77   : > { %1179 = vsyncadd (%p1685_p5), %s279_s16, 4294966784  ;;  %v340_v0 = vld [vmem:[%s282_s10] sm:$0xff]  ;;  %s1209_s27 = smov 1   ;;  %v341_v2 = vld [vmem:[%s282_s10 + $0x8] sm:$0xff]  ;;  %s291_s23 = scalar_lea.vmem [#allocation7], %s870_s20  ;;  %vm354_vm0 = vcmask 1040384  }
  0x78   : > { %v338_v1 = vld [vmem:[%s273_s1] sm:$0xff]  ;;  %430 = vrot.lane.b32.xlu1 %v340_v0, %s1209_s27  ;;  %v339_v3 = vld [vmem:[%s273_s1 + $0x8] sm:$0xff]  ;;  %v438_v6 = vrot.slane %v340_v0, 7  ;;  %v439_v8 = vrot.slane %v341_v2, 7  ;;  %s1210_s28 = smov 127   ;;  %vm542_vm13 = vcmask 121857  }
  0x79   : > { %346 = vrot.lane.b32.xlu0 %v338_v1, %s1209_s27  ;;  %v342_v4 = vld [vmem:[%s291_s23] sm:$0xff]  ;;  %v343_v5 = vld [vmem:[%s291_s23 + $0x8] sm:$0xff]  ;;  %v355_v7 = vrot.slane %v338_v1, 7  ;;  %v356_v9 = vrot.slane %v339_v3, 7  ;;  %vm546_vm14 = vcmask 121856   ;;  %vm552_vm15 = vcmask 1046528  }
  0x7a   : > { %v443_v10 = vsub.f32 %v340_v0, %v438_v6  ;;  %v440_v12 = vsel %vm354_vm0, %v438_v6, %v439_v8  ;;  %v521_v26 = vrot.slane %v342_v4, 7  ;;  %v522_v27 = vrot.slane %v343_v5, 7  ;;  %s1547_s26 = sshll.u32 %s1427_s0, 3  ;;  %s1550_s6 = sshll.u32 %s1266_s22, 7 }
  0x7b   : > { %v360_v11 = vsub.f32 %v338_v1, %v355_v7  ;;  %v357_v13 = vsel %vm354_vm0, %v355_v7, %v356_v9  ;;  %v444_v16 = vsub.f32 %v341_v2, %v440_v12  ;;  %s323_s12 = scalar_lea.vmem [#allocation8], %s1547_s26  ;;  %s655_s7 = scalar_lea.hbm %s1656_s3, %s1550_s6 }
  0x7c   : > { %432 = vrot.lane.b32.xlu1 %v341_v2, %s1209_s27  ;;  %v447_v18 = vmul.f32 %v443_v10, %v443_v10  ;;  %v361_v21 = vsub.f32 %v339_v3, %v357_v13  ;;  %v523_v42 = vsel %vm354_vm0, %v521_v26, %v522_v27  ;;  %s657_s14 = sshll.u32 %s323_s12, 4  ;;  %s634_s8 = scalar_lea.sflag [#allocation4], %s1427_s0  ;;  %s658_s14 = int_to_ptr.vmem [resolvable:$true] %s657_s14 }
  0x7d   : > { %348 = vrot.lane.b32.xlu0 %v339_v3, %s1209_s27  ;;  %v364_v20 = vmul.f32 %v360_v11, %v360_v11  ;;  %v448_v29 = vmul.f32 %v444_v16, %v444_v16  ;;  %s1078_s17 = scalar_lea.vmem %s658_s14, 128  ;;  %p1686_p7 = scmp.ne.s32.totalorder %s1673_s29, 0 }
  0x7e   : > { %v365_v35 = vmul.f32 %v361_v21, %v361_v21  ;;  %p1079_p13 = scmp.ne.s32.totalorder %s658_s14, %s1078_s17  ;;  %s1212_s15 = smov [#allocation8]  }
  0x7f   : > { %s1082_s20 = sshll.u32 %s1212_s15, 4  ;;  %s1083_s20 = int_to_ptr.vmem [resolvable:$false] %s1082_s20 }
  0x80   : > { %515 = vrot.lane.b32.xlu1 %v343_v5, %s1209_s27  ;;  %p1080_p8 = pnand %p1079_p13, %p1686_p7  ;;  %s1084_s25 = scalar_lea.vmem %s1083_s20, 256 }
  0x81   : > { %513 = vrot.lane.b32.xlu0 %v342_v4, %s1209_s27  ;;  %p1085_p1 = scmp.lt.s32.totalorder %s658_s14, %s1083_s20  ;;  %p1086_p3 = scmp.lt.s32.totalorder %s1084_s25, %s1078_s17 }
  0x82   : > { %p1081_p10 = pneg %p1080_p8 }
  0x83   : > { %p1087_p9 = por %p1086_p3, %p1085_p1 }
  0x85   : > { %p1088_p6 = pnand %p1087_p9, %p1081_p10 }
  0xea   : > { %v431_v14 = vpop.permute.xlu1 %430 }
  0xeb   : > { %v347_v15 = vpop.permute.xlu0 %346  ;;  %v436_v17 = vsub.f32 %v340_v0, %v431_v14 }
  0xec   : > { %v352_v19 = vsub.f32 %v338_v1, %v347_v15 }
  0xed   : > { %v445_v22 = vmul.f32 %v436_v17, %v436_v17  ;;  %v451_v23 = vadd.f32 1e-10, %v436_v17 }
  0xee   : > { %v362_v24 = vmul.f32 %v352_v19, %v352_v19  ;;  %v368_v25 = vadd.f32 1e-10, %v352_v19  ;;  %v433_v28 = vpop.permute.xlu1 %432 }
  0xef   : > { %v349_v30 = vpop.permute.xlu0 %348  ;;  %v449_v31 = vadd.f32 %v447_v18, %v445_v22  ;;  %970 = vrcp.f32 %v451_v23  ;;  %v437_v33 = vsub.f32 %v341_v2, %v433_v28 }
  0xf0   : > { %v366_v32 = vadd.f32 %v364_v20, %v362_v24  ;;  %972 = vrcp.f32 %v368_v25  ;;  %v353_v34 = vsub.f32 %v339_v3, %v349_v30 }
  0xf1   : > { %v446_v36 = vmul.f32 %v437_v33, %v437_v33  ;;  %v452_v37 = vadd.f32 1e-10, %v437_v33 }
  0xf2   : > { %v528_v38 = vsub.f32 %v366_v32, %v449_v31  ;;  %v363_v39 = vmul.f32 %v353_v34, %v353_v34  ;;  %v369_v40 = vadd.f32 1e-10, %v353_v34  ;;  %v516_v43 = vpop.permute.xlu1 %515 }
  0xf3   : > { %v514_v41 = vpop.permute.xlu0 %513  ;;  %v450_v44 = vadd.f32 %v448_v29, %v446_v36  ;;  %974 = vrcp.f32 %v452_v37  ;;  %v520_v46 = vmul.f32 %v516_v43, %v343_v5 }
  0xf4   : > { %v519_v45 = vmul.f32 %v514_v41, %v342_v4  ;;  %v367_v47 = vadd.f32 %v365_v35, %v363_v39  ;;  %976 = vrcp.f32 %v369_v40  ;;  %v530_v49 = vand.u32 2147483647, %v528_v38 }
  0xf5   : > { %v1447_v50 = vmul.f32 %v523_v42, %v520_v46 }
  0xf6   : > { %v1445_v48 = vmul.f32 %v521_v26, %v519_v45  ;;  %v529_v51 = vsub.f32 %v367_v47, %v450_v44 }
  0xf8   : > { %v532_v52 = vmul.f32 %v530_v49, %v1445_v48  ;;  %v531_v53 = vand.u32 2147483647, %v529_v51 }
  0xfa   : > { %536 = vrot.lane.b32.xlu0 %v532_v52, %s1210_s28  ;;  %v533_v54 = vmul.f32 %v531_v53, %v1447_v50 }
  0xfc   : > { %v971_v55 = vpop.eup %970  ;;  %538 = vrot.lane.b32.xlu1 %v533_v54, %s1210_s28 }
  0xfd   : > { %v973_v56 = vpop.eup %972  ;;  %v1453_v57 = vmul.f32 %v971_v55, %v443_v10 }
  0xfe   : > { %v1455_v58 = vmul.f32 %v973_v56, %v360_v11 }
  0xff   : > { %v1458_v59 = vand.u32 2147483647, %v1453_v57  ;;  %vm505_vm10 = vcmp.lt.f32.partialorder %v1453_v57, 0.0 }
 0x100   : > { %v975_v60 = vpop.eup %974  ;;  %v1461_v61 = vand.u32 2147483647, %v1455_v58  ;;  %vm422_vm9 = vcmp.lt.f32.partialorder %v1455_v58, 0.0 }
 0x101   : > { %v977_v62 = vpop.eup %976  ;;  %v1463_v63 = vmul.f32 %v975_v60, %v444_v16  ;;  %978 = vrcp.f32 %v1458_v59  ;;  %v469_v4 = vadd.f32 1.0, %v1458_v59  ;;  %vm459_vm1 = vcmp.gt.f32.partialorder %v1458_v59, 2.4142137 }
 0x102   : > { %v1465_v0 = vmul.f32 %v977_v62, %v361_v21  ;;  %v386_v2 = vadd.f32 1.0, %v1461_v61  ;;  %980 = vrcp.f32 %v1461_v61  ;;  %v876_v9 = vadd.f32 -1.0, %v1461_v61 }
 0x103   : > { %v1468_v1 = vand.u32 2147483647, %v1463_v63  ;;  %v882_v11 = vadd.f32 -1.0, %v1458_v59  ;;  %vm376_vm2 = vcmp.gt.f32.partialorder %v1461_v61, 2.4142137  ;;  %vm506_vm12 = vcmp.lt.f32.partialorder %v1463_v63, 0.0 }
 0x104   : > { %v1473_v3 = vand.u32 2147483647, %v1465_v0  ;;  %982 = vrcp.f32 %v386_v2  ;;  %vm461_vm3 = vcmp.gt.f32.partialorder %v1458_v59, 0.41421357  ;;  %vm378_vm4 = vcmp.gt.f32.partialorder %v1461_v61, 0.41421357 }
 0x105   : > { %v470_v5 = vadd.f32 1.0, %v1468_v1  ;;  %984 = vrcp.f32 %v469_v4  ;;  %v883_v14 = vadd.f32 -1.0, %v1468_v1  ;;  %vm462_vm6 = vcmp.gt.f32.partialorder %v1468_v1, 0.41421357 }
 0x106   : > { %v387_v6 = vadd.f32 1.0, %v1473_v3  ;;  %v877_v18 = vadd.f32 -1.0, %v1473_v3  ;;  %vm379_vm5 = vcmp.gt.f32.partialorder %v1473_v3, 0.41421357  ;;  %vm377_vm7 = vcmp.gt.f32.partialorder %v1473_v3, 2.4142137 }
 0x107   : > { %986 = vrcp.f32 %v470_v5  ;;  %vm460_vm8 = vcmp.gt.f32.partialorder %v1468_v1, 2.4142137  ;;  %vm423_vm11 = vcmp.lt.f32.partialorder %v1465_v0, 0.0 }
 0x108   : > { %988 = vrcp.f32 %v387_v6 }
 0x109   : > { %990 = vrcp.f32 %v1473_v3 }
 0x10a   : > { %992 = vrcp.f32 %v1468_v1 }
 0x10e   : > { %v979_v7 = vpop.eup %978 }
 0x10f   : > { %v981_v8 = vpop.eup %980  ;;  %v464_v21 = vmul.f32 -1.0, %v979_v7 }
 0x110   : > { %v381_v16 = vmul.f32 -1.0, %v981_v8 }
 0x111   : > { %v983_v10 = vpop.eup %982 }
 0x112   : > { %v985_v12 = vpop.eup %984  ;;  %v389_v13 = vmul.f32 %v983_v10, %v876_v9  ;;  %v1211_v10 = vmov 0.0  }
 0x113   : > { %v472_v17 = vmul.f32 %v985_v12, %v882_v11  ;;  %v396_v11 = vsel %vm378_vm4, 0.7853982, %v1211_v10 }
 0x114   : > { %v987_v15 = vpop.eup %986  ;;  %v392_v20 = vsel %vm378_vm4, %v389_v13, %v1461_v61 }
 0x115   : > { %v989_v19 = vpop.eup %988  ;;  %v474_v22 = vmul.f32 %v987_v15, %v883_v14  ;;  %v394_v24 = vsel %vm376_vm2, %v381_v16, %v392_v20  ;;  %v475_v25 = vsel %vm461_vm3, %v472_v17, %v1458_v59  ;;  %v479_v14 = vsel %vm461_vm3, 0.7853982, %v1211_v10 }
 0x116   : > { %v991_v23 = vpop.eup %990  ;;  %v391_v26 = vmul.f32 %v989_v19, %v877_v18  ;;  %v400_v28 = vmul.f32 %v394_v24, %v394_v24  ;;  %v477_v29 = vsel %vm459_vm1, %v464_v21, %v475_v25  ;;  %v398_v19 = vsel %vm376_vm2, 1.5707964, %v396_v11 }
 0x117   : > { %v993_v27 = vpop.eup %992  ;;  %v383_v30 = vmul.f32 -1.0, %v991_v23  ;;  %v476_v31 = vsel %vm462_vm6, %v474_v22, %v1468_v1  ;;  %v483_v32 = vmul.f32 %v477_v29, %v477_v29  ;;  %v397_v21 = vsel %vm379_vm5, 0.7853982, %v1211_v10 }
 0x118   : > { %v393_v33 = vsel %vm379_vm5, %v391_v26, %v1473_v3  ;;  %v466_v34 = vmul.f32 -1.0, %v993_v27  ;;  %v402_v35 = vmul.f32 0.080537446, %v400_v28  ;;  %v481_v25 = vsel %vm459_vm1, 1.5707964, %v479_v14 }
 0x119   : > { %v395_v36 = vsel %vm377_vm7, %v383_v30, %v393_v33  ;;  %v485_v37 = vmul.f32 0.080537446, %v483_v32  ;;  %v480_v26 = vsel %vm462_vm6, 0.7853982, %v1211_v10  ;;  %v399_v61 = vsel %vm377_vm7, 1.5707964, %v397_v21 }
 0x11a   : > { %v401_v38 = vmul.f32 %v395_v36, %v395_v36  ;;  %v478_v39 = vsel %vm460_vm8, %v466_v34, %v476_v31  ;;  %v878_v40 = vadd.f32 -0.13877685, %v402_v35  ;;  %v482_v33 = vsel %vm460_vm8, 1.5707964, %v480_v26 }
 0x11b   : > { %v484_v41 = vmul.f32 %v478_v39, %v478_v39  ;;  %v884_v42 = vadd.f32 -0.13877685, %v485_v37 }
 0x11c   : > { %v403_v43 = vmul.f32 0.080537446, %v401_v38  ;;  %v406_v44 = vmul.f32 %v878_v40, %v400_v28 }
 0x11d   : > { %v486_v45 = vmul.f32 0.080537446, %v484_v41  ;;  %v489_v46 = vmul.f32 %v884_v42, %v483_v32 }
 0x11e   : > { %v879_v47 = vadd.f32 -0.13877685, %v403_v43  ;;  %v408_v49 = vadd.f32 0.19977711, %v406_v44 }
 0x11f   : > { %v885_v51 = vadd.f32 -0.13877685, %v486_v45  ;;  %v491_v52 = vadd.f32 0.19977711, %v489_v46 }
 0x120   : > { %v407_v53 = vmul.f32 %v879_v47, %v401_v38  ;;  %v410_v54 = vmul.f32 %v408_v49, %v400_v28 }
 0x121   : > { %v490_v55 = vmul.f32 %v885_v51, %v484_v41  ;;  %v493_v56 = vmul.f32 %v491_v52, %v483_v32 }
 0x122   : > { %v409_v60 = vadd.f32 0.19977711, %v407_v53  ;;  %v880_v62 = vadd.f32 -0.3333295, %v410_v54 }
 0x123   : > { %v492_v2 = vadd.f32 0.19977711, %v490_v55  ;;  %v886_v4 = vadd.f32 -0.3333295, %v493_v56 }
 0x124   : > { %v411_v5 = vmul.f32 %v409_v60, %v401_v38  ;;  %v414_v6 = vmul.f32 %v880_v62, %v400_v28 }
 0x125   : > { %v494_v7 = vmul.f32 %v492_v2, %v484_v41  ;;  %v497_v8 = vmul.f32 %v886_v4, %v483_v32 }
 0x126   : > { %v881_v9 = vadd.f32 -0.3333295, %v411_v5  ;;  %v416_v12 = vmul.f32 %v414_v6, %v394_v24 }
 0x127   : > { %v887_v13 = vadd.f32 -0.3333295, %v494_v7  ;;  %v499_v15 = vmul.f32 %v497_v8, %v477_v29 }
 0x128   : > { %v415_v16 = vmul.f32 %v881_v9, %v401_v38  ;;  %v418_v17 = vadd.f32 %v416_v12, %v394_v24 }
 0x129   : > { %v498_v18 = vmul.f32 %v887_v13, %v484_v41  ;;  %v501_v20 = vadd.f32 %v499_v15, %v477_v29 }
 0x12a   : > { %v417_v22 = vmul.f32 %v415_v16, %v395_v36  ;;  %v420_v23 = vadd.f32 %v418_v17, %v398_v19 }
 0x12b   : > { %v500_v27 = vmul.f32 %v498_v18, %v478_v39  ;;  %v503_v28 = vadd.f32 %v501_v20, %v481_v25 }
 0x12c   : > { %v419_v30 = vadd.f32 %v417_v22, %v395_v36  ;;  %v424_v24 = vsub.f32 0.0, %v420_v23 }
 0x12d   : > { %v502_v31 = vadd.f32 %v500_v27, %v478_v39  ;;  %v507_v29 = vsub.f32 0.0, %v503_v28 }
 0x12e   : > { %v421_v32 = vadd.f32 %v419_v30, %v399_v61  ;;  %v426_v59 = vsel %vm422_vm9, %v424_v24, %v420_v23 }
 0x12f   : > { %v504_v34 = vadd.f32 %v502_v31, %v482_v33  ;;  %v509_v35 = vsel %vm505_vm10, %v507_v29, %v503_v28 }
 0x130   : > { %v425_v37 = vsub.f32 0.0, %v421_v32  ;;  %v566_v38 = vsub.f32 %v426_v59, %v509_v35 }
 0x131   : > { %v508_v36 = vsub.f32 0.0, %v504_v34 }
 0x132   : > { %v427_v3 = vsel %vm423_vm11, %v425_v37, %v421_v32  ;;  %v568_v39 = vand.u32 2147483647, %v566_v38 }
 0x133   : > { %v510_v58 = vsel %vm506_vm12, %v508_v36, %v504_v34 }
 0x134   : > { %v567_v40 = vsub.f32 %v427_v3, %v510_v58  ;;  %v570_v41 = vmul.f32 %v568_v39, %v1445_v48 }
 0x136   : > { %v569_v1 = vand.u32 2147483647, %v567_v40  ;;  %574 = vrot.lane.b32.xlu0 %v570_v41, %s1210_s28 }
 0x138   : > { %v571_v57 = vmul.f32 %v569_v1, %v1447_v50 }
 0x13a   : > { %576 = vrot.lane.b32.xlu1 %v571_v57, %s1210_s28  ;;  %603 = vrot.lane.b32.xlu0 %v1445_v48, %s1210_s28 }
 0x13e   : > { %605 = vrot.lane.b32.xlu1 %v1447_v50, %s1210_s28 }
 0x16c   : > { %v537_v63 = vpop.permute.xlu0 %536 }
 0x16d   : > { %v543_v0 = vsel %vm542_vm13, %v537_v63, 0.0 }
 0x16e   : > { %544 = vadd.xlane.f32.xlu0 %v543_v0  ;;  %v539_v42 = vpop.permute.xlu1 %538 }
 0x16f   : > { %v547_v43 = vsel %vm546_vm14, %v539_v42, 0.0 }
 0x172   : > { %548 = vadd.xlane.f32.xlu0 %v547_v43 }
 0x1a8   : > { %v575_v44 = vpop.permute.xlu0 %574 }
 0x1a9   : > { %v580_v45 = vsel %vm542_vm13, %v575_v44, 0.0 }
 0x1aa   : > { %581 = vadd.xlane.f32.xlu0 %v580_v45 }
 0x1ac   : > { %v577_v46 = vpop.permute.xlu1 %576  ;;  %v604_v49 = vpop.permute.xlu0 %603 }
 0x1ad   : > { %v583_v47 = vsel %vm546_vm14, %v577_v46, 0.0  ;;  %v609_v50 = vsel %vm542_vm13, %v604_v49, 0.0 }
 0x1ae   : > { %584 = vadd.xlane.f32.xlu1 %v583_v47 }
 0x1b0   : > { %v606_v48 = vpop.permute.xlu1 %605 }
 0x1b1   : > { %v612_v51 = vsel %vm546_vm14, %v606_v48, 0.0 }
 0x1b2   : > { %610 = vadd.xlane.f32.xlu1 %v609_v50  ;;  %613 = vadd.xlane.f32.xlu0 %v612_v51 }
 0x1f7   : > { %v545_v52 = vpop.xlane.xlu0 %544 }
 0x1f8   : > { %v553_v54 = vrot.slane %v545_v52, 1 }
 0x1fb   : > { %v549_v53 = vpop.xlane.xlu0 %548 }
 0x1fc   : > { %v554_v55 = vrot.slane %v549_v53, 1 }
 0x1fe   : > { %v555_v56 = vsel %vm552_vm15, %v553_v54, %v554_v55  ;;  %v558_v60 = vsel %vm552_vm15, %v554_v55, 0.0 }
 0x1ff   : > { %v559_v62 = vadd.f32 %v558_v60, %v555_v56 }
 0x201   : > { %v560_v2 = vrot.slane %v559_v62, 4 }
 0x203   : > { %v561_v4 = vadd.f32 %v560_v2, %v559_v62 }
 0x205   : > { %v562_v5 = vrot.slane %v561_v4, 2 }
 0x207   : > { %v563_v6 = vadd.f32 %v562_v5, %v561_v4 }
 0x209   : > { %v564_v7 = vrot.slane %v563_v6, 1 }
 0x20b   : > { %v565_v8 = vadd.f32 %v564_v7, %v563_v6 }
 0x20d   : > { %630 = vst [vmem:[%s323_s12] sm:$0xff] %v565_v8 }
 0x20e   : > { %1091 = shalt.err (!%p1088_p6)
}
 0x20f   : > { %s1092_s1 = scalar_lea.hbm %s655_s7, 128  ;;  %s1096_s10 = scalar_lea.hbm %s1656_s3, 256 }
 0x210   : > { %p1093_p12 = scmp.ne.s32.totalorder %s655_s7, %s1092_s1  ;;  %p1097_p4 = scmp.lt.s32.totalorder %s655_s7, %s1656_s3 }
 0x211   : > { %p1098_p2 = scmp.lt.s32.totalorder %s1096_s10, %s1092_s1 }
 0x212   : > { %p1094_p0 = pnand %p1093_p12, %p1686_p7 }
 0x213   : > { %p1099_p5 = por %p1098_p2, %p1097_p4 }
 0x214   : > { %p1095_p11 = pneg %p1094_p0 }
 0x216   : > { %p1100_p13 = pnand %p1099_p5, %p1095_p11 }
 0x218   : > { %1103 = shalt.err (!%p1100_p13)
}
 0x219   : > { %905 = dma.vmem_to_hbm [thread:$0]  (%p1686_p7), %s658_s14, 128, %s655_s7, %s634_s8  }
 0x21a   : > { %s330_s28 = scalar_lea.vmem [#allocation9], %s1547_s26  ;;  %s1579_s13 = scalar_lea.hbm %s1657_s4, %s1550_s6 }
 0x21b   : > { %s670_s12 = sshll.u32 %s330_s28, 4  ;;  %s337_s7 = scalar_lea.vmem [#allocation11], %s1547_s26  ;;  %s1581_s12 = int_to_ptr.vmem [resolvable:$true] %s670_s12 }
 0x21c   : > { %s1586_s8 = sshll.u32 %s337_s7, 4  ;;  %s1590_s17 = scalar_lea.sflag [#allocation10], %s278_s9  ;;  %s684_s8 = int_to_ptr.vmem [resolvable:$true] %s1586_s8 }
 0x21d   : > { %s1104_s15 = scalar_lea.vmem %s1581_s12, 128  ;;  %s1213_s20 = smov [#allocation9]  }
 0x21e   : > { %p1105_p8 = scmp.ne.s32.totalorder %s1581_s12, %s1104_s15  ;;  %s1108_s25 = sshll.u32 %s1213_s20, 4  ;;  %s1109_s25 = int_to_ptr.vmem [resolvable:$false] %s1108_s25 }
 0x21f   : > { %s1110_s1 = scalar_lea.vmem %s1109_s25, 256  ;;  %p1111_p3 = scmp.lt.s32.totalorder %s1581_s12, %s1109_s25 }
 0x220   : > { %p1106_p10 = pnand %p1105_p8, %p1686_p7  ;;  %p1112_p9 = scmp.lt.s32.totalorder %s1110_s1, %s1104_s15 }
 0x222   : > { %p1107_p1 = pneg %p1106_p10  ;;  %p1113_p6 = por %p1112_p9, %p1111_p3 }
 0x224   : > { %p1114_p12 = pnand %p1113_p6, %p1107_p1 }
 0x233   : > { %v582_v9 = vpop.xlane.xlu0 %581 }
 0x234   : > { %v588_v11 = vrot.slane %v582_v9, 1 }
 0x237   : > { %v585_v10 = vpop.xlane.xlu1 %584 }
 0x238   : > { %v589_v12 = vrot.slane %v585_v10, 1 }
 0x23a   : > { %v590_v13 = vsel %vm552_vm15, %v588_v11, %v589_v12  ;;  %v593_v14 = vsel %vm552_vm15, %v589_v12, 0.0 }
 0x23b   : > { %v594_v15 = vadd.f32 %v593_v14, %v590_v13  ;;  %v614_v16 = vpop.xlane.xlu0 %613  ;;  %v611_v17 = vpop.xlane.xlu1 %610 }
 0x23c   : > { %v618_v18 = vrot.slane %v614_v16, 1  ;;  %v617_v19 = vrot.slane %v611_v17, 1 }
 0x23d   : > { %v595_v20 = vrot.slane %v594_v15, 4 }
 0x23e   : > { %v622_v21 = vsel %vm552_vm15, %v618_v18, 0.0  ;;  %v619_v22 = vsel %vm552_vm15, %v617_v19, %v618_v18 }
 0x23f   : > { %v596_v23 = vadd.f32 %v595_v20, %v594_v15  ;;  %v623_v25 = vadd.f32 %v622_v21, %v619_v22 }
 0x241   : > { %v597_v26 = vrot.slane %v596_v23, 2  ;;  %v624_v27 = vrot.slane %v623_v25, 4 }
 0x243   : > { %v598_v28 = vadd.f32 %v597_v26, %v596_v23  ;;  %v625_v30 = vadd.f32 %v624_v27, %v623_v25 }
 0x245   : > { %v599_v24 = vrot.slane %v598_v28, 1  ;;  %v626_v61 = vrot.slane %v625_v30, 2 }
 0x247   : > { %v600_v31 = vadd.f32 %v599_v24, %v598_v28  ;;  %v627_v29 = vadd.f32 %v626_v61, %v625_v30 }
 0x249   : > { %v628_v32 = vrot.slane %v627_v29, 1  ;;  %631 = vst [vmem:[%s330_s28] sm:$0xff] %v600_v31 }
 0x24a   : > { %1117 = shalt.err (!%p1114_p12)
}
 0x24b   : > { %s1118_s22 = scalar_lea.hbm %s1579_s13, 128  ;;  %s1122_s16 = scalar_lea.hbm %s1657_s4, 256 }
 0x24c   : > { %p1119_p0 = scmp.ne.s32.totalorder %s1579_s13, %s1118_s22  ;;  %p1123_p2 = scmp.lt.s32.totalorder %s1579_s13, %s1657_s4 }
 0x24d   : > { %p1124_p5 = scmp.lt.s32.totalorder %s1122_s16, %s1118_s22 }
 0x24e   : > { %p1120_p11 = pnand %p1119_p0, %p1686_p7 }
 0x24f   : > { %p1125_p13 = por %p1124_p5, %p1123_p2 }
 0x250   : > { %p1121_p4 = pneg %p1120_p11 }
 0x252   : > { %p1126_p8 = pnand %p1125_p13, %p1121_p4 }
 0x254   : > { %1129 = shalt.err (!%p1126_p8)
}
 0x255   : > { %906 = dma.vmem_to_hbm [thread:$0]  (%p1686_p7), %s1581_s12, 128, %s1579_s13, %s1590_s17   ;;  %v629_v33 = vadd.f32 %v628_v32, %v627_v29 }
 0x256   : > { %s681_s14 = scalar_lea.hbm %s1658_s5, %s1550_s6  ;;  %s1130_s11 = scalar_lea.vmem %s684_s8, 128 }
 0x257   : > { %632 = vst [vmem:[%s337_s7] sm:$0xff] %v629_v33  ;;  %p1131_p10 = scmp.ne.s32.totalorder %s684_s8, %s1130_s11  ;;  %s1214_s15 = smov [#allocation11]  }
 0x258   : > { %s1134_s20 = sshll.u32 %s1214_s15, 4  ;;  %s1135_s20 = int_to_ptr.vmem [resolvable:$false] %s1134_s20 }
 0x259   : > { %p1132_p1 = pnand %p1131_p10, %p1686_p7  ;;  %s1136_s25 = scalar_lea.vmem %s1135_s20, 256 }
 0x25a   : > { %p1137_p9 = scmp.lt.s32.totalorder %s684_s8, %s1135_s20  ;;  %p1138_p6 = scmp.lt.s32.totalorder %s1136_s25, %s1130_s11 }
 0x25b   : > { %p1133_p3 = pneg %p1132_p1 }
 0x25c   : > { %p1139_p12 = por %p1138_p6, %p1137_p9 }
 0x25e   : > { %p1140_p0 = pnand %p1139_p12, %p1133_p3 }
 0x260   : > { %1143 = shalt.err (!%p1140_p0)
}
 0x261   : > { %s1144_s12 = scalar_lea.hbm %s681_s14, 128  ;;  %s1148_s13 = scalar_lea.hbm %s1658_s5, 256 }
 0x262   : > { %p1145_p11 = scmp.ne.s32.totalorder %s681_s14, %s1144_s12  ;;  %p1149_p5 = scmp.lt.s32.totalorder %s681_s14, %s1658_s5 }
 0x263   : > { %p1150_p13 = scmp.lt.s32.totalorder %s1148_s13, %s1144_s12 }
 0x264   : > { %p1146_p4 = pnand %p1145_p11, %p1686_p7 }
 0x265   : > { %p1151_p8 = por %p1150_p13, %p1149_p5 }
 0x266   : > { %p1147_p2 = pneg %p1146_p4 }
 0x268   : > { %p1152_p10 = pnand %p1151_p8, %p1147_p2 }
 0x26a   : > { %1155 = shalt.err (!%p1152_p10)
}
 0x26b   : > { %907 = dma.vmem_to_hbm [thread:$0]  (%p1686_p7), %s684_s8, 128, %s681_s14, %s1590_s17  }
 0x26c PF: > { %s695_s22 = sand.u32 1, %s1190_s18   ;;  %p1687_p1 = scmp.ne.s32.totalorder %s1674_s30, 0 }
 0x26d   : > { %p1688_p3 = scmp.ge.s32.totalorder %s1202_s21, 2  ;;  %s696_s9 = scalar_lea.sflag [#allocation4], %s695_s22 }
 0x26f   : > { %p922_p9 = pnand %p1688_p3, %p1687_p1 }
 0x271   : > { %p923_p6 = pneg %p922_p9 }
 0x273   : > { %1181 = dma.done.wait (%p923_p6), %s696_s9, 128  }
 0x274   : > { %1183 = vsyncadd (%p923_p6), %s696_s9, 4294967168  ;;  %s1689_s0 = sadd.s32 4294967294, %s1202_s21  }
 0x275   : > { %s704_s16 = sand.u32 1, %s1689_s0  }
 0x276   : > { %s705_s10 = scalar_lea.sflag [#allocation10], %s704_s16 }
 0x277   : > { %1185 = dma.done.wait (%p923_p6), %s705_s10, 256  }
 0x278   : > { %1187 = vsyncadd (%p923_p6), %s705_s10, 4294967040  ;;  %s1690_s29 = sld [smem:[#allocation16_spill]]  ;;  %p25_p7 = scmp.ge.s32.totalorder %s1270_s24, 4  }
 0x279   : > { %s1691_s20 = sld [smem:[#allocation17_spill]]  ;;  %s1692_s18 = smov %s1194_s19 }
 0x27a   : > { %s1694_s21 = smov %s1270_s24  ;;  %27 = sbr.rel (!%p25_p7) target bundleno = 12 (0xc), region = 133 }
 0x27e   : > { %s1693_s19 = smov %s1690_s29 }
 0x27f   :  { %719 = vsyncpa [#allocation3], 1 }
 0x280   :  { %721 = vsyncpa [#allocation3 + $0x1], 1 }
 0x281   :  { %722 = vsyncpa [#allocation6], 1 }
 0x282   :  { %724 = vsyncpa [#allocation6 + $0x1], 1 }
 0x283   :  { %725 = vsyncpa [#allocation4], 1 }
 0x284   :  { %727 = vsyncpa [#allocation4 + $0x1], 1 }
 0x285   :  { %728 = vsyncpa [#allocation10], 1 }
 0x286   :  { %730 = vsyncpa [#allocation10 + $0x1], 1 }

</bundles_post_ra>
